<compile_context>
chip_gen: v6e
topology: v6e:2x2x1
jax: 0.10.0
libtpu: 0.0.40
codegen_flags: <defaults>
</compile_context>

<pallas_src>
import jax
import jax.numpy as jnp
from jax.experimental import pallas as pl
from jax.experimental.pallas import tpu as pltpu


def _round_up(x, m):
    return (x + m - 1) // m * m


def mlp_kernel(x_ref, w1_ref, b1_ref, w2_ref, b2_ref, o_ref):
    # x_ref : (TB, K)  bf16  VMEM  (batch tile)
    # w1_ref: (K, H)   bf16  VMEM  (resident across grid)
    # b1_ref: (1, H)   f32   VMEM
    # w2_ref: (H, N)   bf16  VMEM  (resident across grid)
    # b2_ref: (1, N)   f32   VMEM
    # o_ref : (TB, N)  f32   VMEM  (lane-dense, padded N)
    h = jnp.dot(x_ref[...], w1_ref[...], preferred_element_type=jnp.float32)
    h = jnp.maximum(h + b1_ref[...], 0.0)            # bias + ReLU in f32 (VPU)
    # dropout (eval mode) -> identity
    out = jnp.dot(h.astype(w2_ref.dtype), w2_ref[...],
                  preferred_element_type=jnp.float32)
    o_ref[...] = (out + b2_ref[...]).astype(o_ref.dtype)


def mlp_forward(x, w1, b1, w2, b2, *, batch_tile=256):
    """x: (B, C, H, W) float32.  w1: (dim_in, dim_h), w2: (dim_h, dim_out).
    Returns (B, dim_out) float32."""
    B = x.shape[0]
    dim_in = x.shape[1] * x.shape[-2] * x.shape[-1]
    dim_hidden = w1.shape[1]
    dim_out = w2.shape[1]

    x2d = x.reshape(B, dim_in).astype(jnp.float32)   # same as torch .view

    # Lane-pad all feature dims to multiples of 128 (zero padding is inert:
    # padded hidden cols get 0 weight + 0 bias -> relu(0)=0 -> 0 contribution).
    K = _round_up(dim_in, 128)
    H = _round_up(dim_hidden, 128)
    N = _round_up(dim_out, 128)

    # Batch tile: at least 8 sublanes, capped to bound VMEM on v7x (64 MiB).
    TB = batch_tile if B >= batch_tile else _round_up(max(B, 1), 8)
    B_pad = _round_up(B, TB)
    n_tiles = B_pad // TB

    # Pad + cast operands once in the wrapper (not per kernel invocation).
    xp = jnp.zeros((B_pad, K), jnp.bfloat16).at[:B, :dim_in].set(
        x2d.astype(jnp.bfloat16))
    w1p = jnp.zeros((K, H), jnp.bfloat16).at[:dim_in, :dim_hidden].set(
        w1.astype(jnp.bfloat16))
    b1p = jnp.zeros((1, H), jnp.float32).at[:, :dim_hidden].set(
        b1.reshape(1, dim_hidden).astype(jnp.float32))
    w2p = jnp.zeros((H, N), jnp.bfloat16).at[:dim_hidden, :dim_out].set(
        w2.astype(jnp.bfloat16))
    b2p = jnp.zeros((1, N), jnp.float32).at[:, :dim_out].set(
        b2.reshape(1, dim_out).astype(jnp.float32))

    # Deeper input pipelining only pays off when there are several batch tiles.
    if n_tiles >= 3:
        x_spec = pl.BlockSpec((TB, K), lambda i: (i, 0),
                              pipeline_mode=pl.Buffered(3))
    else:
        x_spec = pl.BlockSpec((TB, K), lambda i: (i, 0))

    flops = 2 * B_pad * K * H + 2 * B_pad * H * N
    bytes_accessed = (xp.size * 2 + w1p.size * 2 + w2p.size * 2
                      + b1p.size * 4 + b2p.size * 4 + B_pad * N * 4)

    out_padded = pl.pallas_call(
        mlp_kernel,
        out_shape=jax.ShapeDtypeStruct((B_pad, N), jnp.float32),
        grid=(n_tiles,),
        in_specs=[
            x_spec,                                       # batch-tiled input
            pl.BlockSpec((K, H), lambda i: (0, 0)),       # W1 resident
            pl.BlockSpec((1, H), lambda i: (0, 0)),       # b1 resident
            pl.BlockSpec((H, N), lambda i: (0, 0)),       # W2 resident
            pl.BlockSpec((1, N), lambda i: (0, 0)),       # b2 resident
        ],
        out_specs=pl.BlockSpec((TB, N), lambda i: (i, 0)),
        compiler_params=pltpu.CompilerParams(
            dimension_semantics=("parallel",),
            vmem_limit_bytes=64 << 20),
        cost_estimate=pl.CostEstimate(
            flops=flops, transcendentals=0, bytes_accessed=bytes_accessed),
    )(xp, w1p, b1p, w2p, b2p)

    # Slice away batch + lane padding outside the kernel.
    return out_padded[:B, :dim_out]


def init_linear_params(key, fan_in, fan_out):
    """Deterministic init mimicking torch.nn.Linear (uniform +-1/sqrt(fan_in))."""
    kw, kb = jax.random.split(key)
    bound = 1.0 / jnp.sqrt(float(fan_in))
    # stored transposed vs torch: (in, out) so the kernel does x @ W
    w = jax.random.uniform(kw, (fan_in, fan_out), jnp.float32, -bound, bound)
    b = jax.random.uniform(kb, (1, fan_out), jnp.float32, -bound, bound)
    return w, b


if __name__ == "__main__":
    key = jax.random.PRNGKey(0)
    k_x, k_l1, k_l2 = jax.random.split(key, 3)

    # Small, module-consistent shapes: x is (B, C, H, W) = (2, 4, 16, 16)
    B, C, H, W = 2, 4, 16, 16
    dim_in = C * H * W          # 1024
    dim_hidden = 64
    dim_out = 10

    x = jax.random.normal(k_x, (B, C, H, W), jnp.float32)
    w1, b1 = init_linear_params(k_l1, dim_in, dim_hidden)
    w2, b2 = init_linear_params(k_l2, dim_hidden, dim_out)

    out = mlp_forward(x, w1, b1, w2, b2)
    jax.block_until_ready(out)

    # Pure-JAX f32 reference (eval-mode dropout = identity). Kernel uses bf16
    # MXU operands with f32 accumulation, so allow bf16-level tolerance.
    x2d = x.reshape(B, dim_in)
    ref = jnp.maximum(x2d @ w1 + b1, 0.0) @ w2 + b2
    assert out.shape == (B, dim_out)
    assert jnp.allclose(out, ref, atol=3e-2, rtol=3e-2), (
        float(jnp.max(jnp.abs(out - ref))))

    print("KERNEL_OK")
</pallas_src>

<mosaic_0001>
module attributes {stable_mosaic.version = 11 : i64} {
  func.func @mlp_kernel(%arg0: i32, %arg1: memref<8x1024xbf16, #tpu.memory_space<vmem>>, %arg2: memref<1024x128xbf16, #tpu.memory_space<vmem>>, %arg3: memref<1x128xf32, #tpu.memory_space<vmem>>, %arg4: memref<128x128xbf16, #tpu.memory_space<vmem>>, %arg5: memref<1x128xf32, #tpu.memory_space<vmem>>, %arg6: memref<8x128xf32, #tpu.memory_space<vmem>>) attributes {dimension_semantics = [#tpu.dimension_semantics<parallel>], iteration_bounds = array<i64: 1>, scalar_prefetch = 0 : i64, scratch_operands = 0 : i64, tpu.core_type = #tpu.core_type<tc>, window_params = [{transform_indices = @transform_0, window_bounds = array<i64: 8, 1024>}, {pipeline_mode = #tpu.pipeline_mode<synchronous>, transform_indices = @transform_1, window_bounds = array<i64: 1024, 128>}, {pipeline_mode = #tpu.pipeline_mode<synchronous>, transform_indices = @transform_2, window_bounds = array<i64: 1, 128>}, {pipeline_mode = #tpu.pipeline_mode<synchronous>, transform_indices = @transform_3, window_bounds = array<i64: 128, 128>}, {pipeline_mode = #tpu.pipeline_mode<synchronous>, transform_indices = @transform_4, window_bounds = array<i64: 1, 128>}, {transform_indices = @transform_5, window_bounds = array<i64: 8, 128>}]} {
    %c0 = arith.constant 0 : index
    %c0_0 = arith.constant 0 : index
    %0 = vector.load %arg1[%c0, %c0_0] : memref<8x1024xbf16, #tpu.memory_space<vmem>>, vector<8x1024xbf16>
    %c0_1 = arith.constant 0 : index
    %c0_2 = arith.constant 0 : index
    %1 = vector.load %arg2[%c0_1, %c0_2] : memref<1024x128xbf16, #tpu.memory_space<vmem>>, vector<1024x128xbf16>
    %cst = arith.constant dense<0.000000e+00> : vector<8x128xf32>
    %2 = tpu.matmul %0, %1, %cst {dimension_numbers = #tpu.dot_dimension_numbers<[1], [0], [0], [1], [0, 0, 1, 1], [], []>} : vector<8x1024xbf16>, vector<1024x128xbf16>, vector<8x128xf32> -> vector<8x128xf32>
    %c0_3 = arith.constant 0 : index
    %c0_4 = arith.constant 0 : index
    %3 = vector.load %arg3[%c0_3, %c0_4] : memref<1x128xf32, #tpu.memory_space<vmem>>, vector<1x128xf32>
    %4 = vector.broadcast %3 : vector<1x128xf32> to vector<8x128xf32>
    %5 = arith.addf %2, %4 : vector<8x128xf32>
    %cst_5 = arith.constant 0.000000e+00 : f32
    %6 = vector.broadcast %cst_5 : f32 to vector<8x128xf32>
    %7 = arith.maximumf %5, %6 : vector<8x128xf32>
    %8 = arith.truncf %7 : vector<8x128xf32> to vector<8x128xbf16>
    %c0_6 = arith.constant 0 : index
    %c0_7 = arith.constant 0 : index
    %9 = vector.load %arg4[%c0_6, %c0_7] : memref<128x128xbf16, #tpu.memory_space<vmem>>, vector<128x128xbf16>
    %cst_8 = arith.constant dense<0.000000e+00> : vector<8x128xf32>
    %10 = tpu.matmul %8, %9, %cst_8 {dimension_numbers = #tpu.dot_dimension_numbers<[1], [0], [0], [1], [0, 0, 1, 1], [], []>} : vector<8x128xbf16>, vector<128x128xbf16>, vector<8x128xf32> -> vector<8x128xf32>
    %c0_9 = arith.constant 0 : index
    %c0_10 = arith.constant 0 : index
    %11 = vector.load %arg5[%c0_9, %c0_10] : memref<1x128xf32, #tpu.memory_space<vmem>>, vector<1x128xf32>
    %12 = vector.broadcast %11 : vector<1x128xf32> to vector<8x128xf32>
    %13 = arith.addf %10, %12 : vector<8x128xf32>
    %c0_11 = arith.constant 0 : index
    %c0_12 = arith.constant 0 : index
    %14 = vector.load %arg6[%c0_11, %c0_12] : memref<8x128xf32, #tpu.memory_space<vmem>>, vector<8x128xf32>
    tpu.vector_store %arg6[%c0_11, %c0_12], %13 {strides = array<i32>} : memref<8x128xf32, #tpu.memory_space<vmem>>, vector<8x128xf32>,
    return
  }
  func.func @transform_0(%arg0: i32) -> (i32, i32) {
    %c0_i32 = arith.constant 0 : i32
    %c0_i32_0 = arith.constant 0 : i32
    return %arg0, %c0_i32 : i32, i32
  }
  func.func @transform_1(%arg0: i32) -> (i32, i32) {
    %c0_i32 = arith.constant 0 : i32
    %c0_i32_0 = arith.constant 0 : i32
    %c0_i32_1 = arith.constant 0 : i32
    return %c0_i32, %c0_i32_0 : i32, i32
  }
  func.func @transform_2(%arg0: i32) -> (i32, i32) {
    %c0_i32 = arith.constant 0 : i32
    %c0_i32_0 = arith.constant 0 : i32
    %c0_i32_1 = arith.constant 0 : i32
    return %c0_i32, %c0_i32_0 : i32, i32
  }
  func.func @transform_3(%arg0: i32) -> (i32, i32) {
    %c0_i32 = arith.constant 0 : i32
    %c0_i32_0 = arith.constant 0 : i32
    %c0_i32_1 = arith.constant 0 : i32
    return %c0_i32, %c0_i32_0 : i32, i32
  }
  func.func @transform_4(%arg0: i32) -> (i32, i32) {
    %c0_i32 = arith.constant 0 : i32
    %c0_i32_0 = arith.constant 0 : i32
    %c0_i32_1 = arith.constant 0 : i32
    return %c0_i32, %c0_i32_0 : i32, i32
  }
  func.func @transform_5(%arg0: i32) -> (i32, i32) {
    %c0_i32 = arith.constant 0 : i32
    %c0_i32_0 = arith.constant 0 : i32
    return %arg0, %c0_i32 : i32, i32
  }
}

</mosaic_0001>

<bundles_post_ra>
// kernel: tpu_custom_call.1
= control target key start
LH: loop header
LB: loop body
LE: loop exit
PB: predicated region body
PF: predicated region fallthrough
CT: control target
= control target key end

     0   :  { %10 = vsyncpa [#allocation3], 0  ;;  %s1331_s0 = inlined_call_operand.hbm [shape: bf16[8,1024], index: 0, kind: input, shape index: {}]   ;;  %s1332_s1 = inlined_call_operand.hbm [shape: bf16[1024,128], index: 1, kind: input, shape index: {}]   ;;  %s1333_s2 = inlined_call_operand.vmem [shape: f32[1,128], index: 2, kind: input, shape index: {}]   ;;  %s1334_s3 = inlined_call_operand.hbm [shape: bf16[128,128], index: 3, kind: input, shape index: {}]   ;;  %s1335_s4 = inlined_call_operand.vmem [shape: f32[1,128], index: 4, kind: input, shape index: {}]   ;;  %s1336_s5 = inlined_call_operand.hbm [shape: f32[8,128], index: 5, kind: output, shape index: {}]  }
   0x1   :  { %11 = vsyncpa [#allocation6], 0 }
   0x2   :  { %12 = vsyncpa [#allocation4], 0  ;;  %s1275_s18 = smov [#allocation5]  }
   0x3   :  { %s28_s19 = sshll.u32 %s1275_s18, 4  ;;  %s29_s19 = int_to_ptr.vmem [resolvable:$true] %s28_s19 }
   0x4   :  { %s1197_s20 = scalar_lea.vmem %s29_s19, 8192  ;;  %p1202_p1 = scmp.lt.s32.totalorder %s29_s19, %s29_s19 }
   0x5   :  { %p1198_p0 = scmp.ne.s32.totalorder %s29_s19, %s1197_s20  ;;  %p1203_p2 = scmp.lt.s32.totalorder %s1197_s20, %s1197_s20 }
   0x7   :  { %p1204_p3 = por %p1203_p2, %p1202_p1 }
   0x9   :  { %p1205_p4 = pnand %p1204_p3, %p1198_p0 }
   0xb   :  { %1208 = shalt.err (!%p1205_p4)
}
   0xc   :  { %s1276_s21 = smov 64   ;;  %s1277_s22 = smov 4  }
   0xd   :  { %34 = dma.hbm_to_vmem [thread:$0]  %s1332_s1, 8192, %s29_s19, [#allocation6], %s1276_s21, %s1276_s21, %s1277_s22  }
   0xe   :  { %s1278_s25 = smov [#allocation2]   ;;  %s1279_s27 = smov [#allocation7]  }
   0xf   :  { %s19_s26 = sshll.u32 %s1278_s25, 4  ;;  %s42_s28 = sshll.u32 %s1279_s27, 4  ;;  %s20_s26 = int_to_ptr.vmem [resolvable:$true] %s19_s26  ;;  %s43_s28 = int_to_ptr.vmem [resolvable:$true] %s42_s28 }
  0x10   :  { %s1217_s29 = scalar_lea.vmem %s20_s26, 512  ;;  %p1222_p6 = scmp.lt.s32.totalorder %s20_s26, %s20_s26 }
  0x11   :  { %p1218_p5 = scmp.ne.s32.totalorder %s20_s26, %s1217_s29  ;;  %p1223_p7 = scmp.lt.s32.totalorder %s1217_s29, %s1217_s29 }
  0x13   :  { %p1224_p8 = por %p1223_p7, %p1222_p6 }
  0x15   :  { %p1225_p9 = pnand %p1224_p8, %p1218_p5 }
  0x17   :  { %1228 = shalt.err (!%p1225_p9)
}
  0x18   :  { %22 = dma.hbm_to_vmem [thread:$0]  %s1331_s0, 512, %s20_s26, [#allocation3]  }
  0x19   :  { %s1237_s7 = scalar_lea.vmem %s43_s28, 1024  ;;  %p1242_p11 = scmp.lt.s32.totalorder %s43_s28, %s43_s28 }
  0x1a   :  { %p1238_p10 = scmp.ne.s32.totalorder %s43_s28, %s1237_s7  ;;  %p1243_p12 = scmp.lt.s32.totalorder %s1237_s7, %s1237_s7 }
  0x1c   :  { %p1244_p13 = por %p1243_p12, %p1242_p11 }
  0x1e   :  { %p1245_p0 = pnand %p1244_p13, %p1238_p10 }
  0x20   :  { %1248 = shalt.err (!%p1245_p0)
}
  0x21   :  { %48 = dma.hbm_to_vmem [thread:$0]  %s1334_s3, 1024, %s43_s28, [#allocation6], %s1276_s21, %s1276_s21, %s1277_s22  }
  0x22   :  { %1269 = dma.done.wait [#allocation3], 512  }
  0x23   :  { %1270 = vsyncadd [#allocation3], 4294966784 }
  0x24   :  { %1271 = dma.done.wait [#allocation6], 9216  }
  0x25   :  { %1272 = vsyncadd [#allocation6], 4294958080  ;;  %v1109_v0 = vld [vmem:[#allocation5 + $0x78] sm:$0xff]   ;;  %v1113_v4 = vld [vmem:[#allocation5 + $0x70] sm:$0xff]   ;;  %vm1281_vm0 = vmmov 0   ;;  %s1282_s10 = smov [#allocation8]  }
  0x26   :  { %v1110_v1 = vld [vmem:[#allocation5 + $0xf8] sm:$0xff]   ;;  %984 = vmatprep.subr.bf16.mxu0 %v1109_v0  ;;  %v1114_v5 = vld [vmem:[#allocation5 + $0xf0] sm:$0xff]   ;;  %v1117_v8 = vld [vmem:[#allocation5 + $0x68] sm:$0xff]   ;;  %s892_s11 = sshll.u32 %s1282_s10, 4  ;;  %s893_s11 = int_to_ptr.vmem [resolvable:$true] %s892_s11 }
  0x27   :  { %v1111_v2 = vld [vmem:[#allocation5 + $0x38] sm:$0xff]   ;;  %1006 = vmatprep.subr.bf16.mxu1 %v1110_v1  ;;  %v1115_v6 = vld [vmem:[#allocation5 + $0x30] sm:$0xff]   ;;  %v1118_v9 = vld [vmem:[#allocation5 + $0xe8] sm:$0xff]   ;;  %s1249_s12 = scalar_lea.vmem %s893_s11, 128  ;;  %p1254_p2 = scmp.lt.s32.totalorder %s893_s11, %s893_s11 }
  0x28   :  { %v1112_v3 = vld [vmem:[#allocation5 + $0xb8] sm:$0xff]   ;;  %985 = vmatpush3.bf16.msra.mxu0 %v1111_v2  ;;  %v1116_v7 = vld [vmem:[#allocation5 + $0xb0] sm:$0xff]   ;;  %v1119_v10 = vld [vmem:[#allocation5 + $0x28] sm:$0xff]   ;;  %p1250_p1 = scmp.ne.s32.totalorder %s893_s11, %s1249_s12  ;;  %p1255_p3 = scmp.lt.s32.totalorder %s1249_s12, %s1249_s12 }
  0x29   :  { %1007 = vmatpush3.bf16.msra.mxu1 %v1112_v3  ;;  %986 = vmatprep.subr.bf16.mxu0 %v1113_v4  ;;  %v1120_v11 = vld [vmem:[#allocation5 + $0xa8] sm:$0xff]   ;;  %v1121_v12 = vld [vmem:[#allocation5 + $0x60] sm:$0xff]   ;;  %v1125_v16 = vld [vmem:[#allocation5 + $0x58] sm:$0xff]  }
  0x2a   :  { %1008 = vmatprep.subr.bf16.mxu1 %v1114_v5  ;;  %v1122_v13 = vld [vmem:[#allocation5 + $0xe0] sm:$0xff]   ;;  %v1126_v17 = vld [vmem:[#allocation5 + $0xd8] sm:$0xff]   ;;  %v1129_v20 = vld [vmem:[#allocation5 + $0x50] sm:$0xff]   ;;  %p1256_p4 = por %p1255_p3, %p1254_p2 }
  0x2b   :  { %v1123_v14 = vld [vmem:[#allocation5 + $0x20] sm:$0xff]   ;;  %v1127_v18 = vld [vmem:[#allocation5 + $0x18] sm:$0xff]   ;;  %v1130_v21 = vld [vmem:[#allocation5 + $0xd0] sm:$0xff]  }
  0x2c   :  { %987 = vmatpush3.bf16.msra.mxu0 %v1115_v6  ;;  %v1124_v15 = vld [vmem:[#allocation5 + $0xa0] sm:$0xff]   ;;  %v1128_v19 = vld [vmem:[#allocation5 + $0x98] sm:$0xff]   ;;  %v1131_v22 = vld [vmem:[#allocation5 + $0x10] sm:$0xff]   ;;  %p1257_p5 = pnand %p1256_p4, %p1250_p1 }
  0x2d   :  { %1009 = vmatpush3.bf16.msra.mxu1 %v1116_v7  ;;  %988 = vmatprep.subr.bf16.mxu0 %v1117_v8  ;;  %v1132_v23 = vld [vmem:[#allocation5 + $0x90] sm:$0xff]   ;;  %v1133_v24 = vld [vmem:[#allocation5 + $0x48] sm:$0xff]   ;;  %v1137_v28 = vld [vmem:[#allocation5 + $0x40] sm:$0xff]  }
  0x2e   :  { %1010 = vmatprep.subr.bf16.mxu1 %v1118_v9  ;;  %v1134_v25 = vld [vmem:[#allocation5 + $0xc8] sm:$0xff]   ;;  %v1138_v29 = vld [vmem:[#allocation5 + $0xc0] sm:$0xff]   ;;  %v1145_v38 = vld [vmem:[#allocation5 + $0x178] sm:$0xff]  }
  0x2f   :  { %v1135_v26 = vld [vmem:[#allocation5 + $0x8] sm:$0xff]   ;;  %v1139_v30 = vld [vmem:[#allocation5] sm:$0xff]   ;;  %v1146_v39 = vld [vmem:[#allocation5 + $0x1f8] sm:$0xff]  }
  0x30   :  { %989 = vmatpush3.bf16.msra.mxu0 %v1119_v10  ;;  %v1136_v27 = vld [vmem:[#allocation5 + $0x88] sm:$0xff]   ;;  %v1140_v31 = vld [vmem:[#allocation5 + $0x80] sm:$0xff]   ;;  %v1147_v40 = vld [vmem:[#allocation5 + $0x138] sm:$0xff]  }
  0x31   :  { %1011 = vmatpush3.bf16.msra.mxu1 %v1120_v11  ;;  %990 = vmatprep.subr.bf16.mxu0 %v1121_v12  ;;  %v61_v32 = vld [vmem:[#allocation2] sm:$0xff]  ;;  %v62_v33 = vld [vmem:[#allocation2 + $0x8] sm:$0xff]  ;;  %v1148_v41 = vld [vmem:[#allocation5 + $0x1b8] sm:$0xff]  }
  0x32   :  { %1012 = vmatprep.subr.bf16.mxu1 %v1122_v13  ;;  %v903_v34 = vcombine.low %v61_v32, %v61_v32  ;;  %v904_v35 = vcombine.high %v61_v32, %v61_v32  ;;  %v905_v36 = vcombine.low %v62_v33, %v62_v33  ;;  %v906_v37 = vcombine.high %v62_v33, %v62_v33  ;;  %v1149_v42 = vld [vmem:[#allocation5 + $0x170] sm:$0xff]   ;;  %v1153_v46 = vld [vmem:[#allocation5 + $0x168] sm:$0xff]   ;;  %v1157_v50 = vld [vmem:[#allocation5 + $0x160] sm:$0xff]  }
  0x33   :  { %v1150_v43 = vld [vmem:[#allocation5 + $0x1f0] sm:$0xff]   ;;  %v1154_v47 = vld [vmem:[#allocation5 + $0x1e8] sm:$0xff]   ;;  %v1158_v51 = vld [vmem:[#allocation5 + $0x1e0] sm:$0xff]   ;;  %v1280_v13 = vmov 0.0  }
  0x34   :  { %991 = vmatpush3.bf16.msra.mxu0 %v1123_v14  ;;  %644 = vmatprep.mubr.bf16.mxu0 %v904_v35  ;;  %v1151_v44 = vld [vmem:[#allocation5 + $0x130] sm:$0xff]   ;;  %v1155_v48 = vld [vmem:[#allocation5 + $0x128] sm:$0xff]   ;;  %v1159_v52 = vld [vmem:[#allocation5 + $0x120] sm:$0xff]  }
  0x35   :  { %1013 = vmatpush3.bf16.msra.mxu1 %v1124_v15  ;;  %992 = vmatprep.subr.bf16.mxu0 %v1125_v16  ;;  %v1152_v45 = vld [vmem:[#allocation5 + $0x1b0] sm:$0xff]   ;;  %v1156_v49 = vld [vmem:[#allocation5 + $0x1a8] sm:$0xff]   ;;  %v1160_v53 = vld [vmem:[#allocation5 + $0x1a0] sm:$0xff]  }
  0x36   :  { %1014 = vmatprep.subr.bf16.mxu1 %v1126_v17  ;;  %684 = vmatprep.mubr.bf16.mxu1 %v906_v37  ;;  %v1161_v54 = vld [vmem:[#allocation5 + $0x158] sm:$0xff]   ;;  %v1165_v58 = vld [vmem:[#allocation5 + $0x150] sm:$0xff]   ;;  %v1169_v62 = vld [vmem:[#allocation5 + $0x148] sm:$0xff]  }
  0x37   :  { %v1162_v55 = vld [vmem:[#allocation5 + $0x1d8] sm:$0xff]   ;;  %v1166_v59 = vld [vmem:[#allocation5 + $0x1d0] sm:$0xff]   ;;  %v1170_v63 = vld [vmem:[#allocation5 + $0x1c8] sm:$0xff]  }
  0x38   :  { %993 = vmatpush3.bf16.msra.mxu0 %v1127_v18  ;;  %v1163_v56 = vld [vmem:[#allocation5 + $0x118] sm:$0xff]   ;;  %v1167_v60 = vld [vmem:[#allocation5 + $0x110] sm:$0xff]   ;;  %v1171_v0 = vld [vmem:[#allocation5 + $0x108] sm:$0xff]  }
  0x39   :  { %1015 = vmatpush3.bf16.msra.mxu1 %v1128_v19  ;;  %994 = vmatprep.subr.bf16.mxu0 %v1129_v20  ;;  %v1164_v57 = vld [vmem:[#allocation5 + $0x198] sm:$0xff]   ;;  %v1168_v61 = vld [vmem:[#allocation5 + $0x190] sm:$0xff]   ;;  %v1172_v1 = vld [vmem:[#allocation5 + $0x188] sm:$0xff]  }
  0x3a   :  { %1016 = vmatprep.subr.bf16.mxu1 %v1130_v21  ;;  %v1173_v2 = vld [vmem:[#allocation5 + $0x140] sm:$0xff]   ;;  %v63_v6 = vld [vmem:[#allocation2 + $0x10] sm:$0xff]  ;;  %v64_v9 = vld [vmem:[#allocation2 + $0x18] sm:$0xff] }
  0x3b   :  { %v1174_v3 = vld [vmem:[#allocation5 + $0x1c0] sm:$0xff]   ;;  %v907_v7 = vcombine.low %v63_v6, %v63_v6  ;;  %v908_v8 = vcombine.high %v63_v6, %v63_v6  ;;  %v909_v10 = vcombine.low %v64_v9, %v64_v9  ;;  %v910_v11 = vcombine.high %v64_v9, %v64_v9  ;;  %v1181_v12 = vld [vmem:[#allocation7 + $0x38] sm:$0xff]   ;;  %v1182_v14 = vld [vmem:[#allocation7 + $0x30] sm:$0xff]  }
  0x3c   :  { %995 = vmatpush3.bf16.msra.mxu0 %v1131_v22  ;;  %v1175_v4 = vld [vmem:[#allocation5 + $0x100] sm:$0xff]   ;;  %v1183_v15 = vld [vmem:[#allocation7 + $0x28] sm:$0xff]   ;;  %v1185_v17 = vld [vmem:[#allocation7 + $0x18] sm:$0xff]  }
  0x3d   :  { %1017 = vmatpush3.bf16.msra.mxu1 %v1132_v23  ;;  %996 = vmatprep.subr.bf16.mxu0 %v1133_v24  ;;  %v1176_v5 = vld [vmem:[#allocation5 + $0x180] sm:$0xff]   ;;  %v1186_v18 = vld [vmem:[#allocation7 + $0x10] sm:$0xff]   ;;  %v1187_v19 = vld [vmem:[#allocation7 + $0x8] sm:$0xff]  }
  0x3e   :  { %1018 = vmatprep.subr.bf16.mxu1 %v1134_v25  ;;  %v1184_v16 = vld [vmem:[#allocation7 + $0x20] sm:$0xff]  }
  0x3f   :  { %v1188_v20 = vld [vmem:[#allocation7] sm:$0xff]  }
  0x40   :  { %997 = vmatpush3.bf16.msra.mxu0 %v1135_v26 }
  0x41   :  { %1019 = vmatpush3.bf16.msra.mxu1 %v1136_v27  ;;  %998 = vmatprep.subr.bf16.mxu0 %v1137_v28 }
  0x42   :  { %1020 = vmatprep.subr.bf16.mxu1 %v1138_v29 }
  0x44   :  { %999 = vmatpush3.bf16.msra.mxu0 %v1139_v30  ;;  %v902_v30 = vld [vmem:[%s1333_s2] ss:$0 sm:$0xff] }
  0x45   :  { %1021 = vmatpush3.bf16.msra.mxu1 %v1140_v31  ;;  %1028 = vmatprep.subr.bf16.mxu0 %v1145_v38 }
  0x46   :  { %1050 = vmatprep.subr.bf16.mxu1 %v1146_v39 }
  0x47   :  { %645 = vmatmul.mubr.bf16.vlgmr.msra.gmra.mxu0 %v903_v34 }
  0x48   :  { %685 = vmatmul.mubr.bf16.vlgmr.msra.gmra.mxu1 %v905_v36  ;;  %1029 = vmatpush3.bf16.msra.mxu0 %v1147_v40 }
  0x49   :  { %1051 = vmatpush3.bf16.msra.mxu1 %v1148_v41  ;;  %1030 = vmatprep.subr.bf16.mxu0 %v1149_v42 }
  0x4a   :  { %1052 = vmatprep.subr.bf16.mxu1 %v1150_v43  ;;  %724 = vmatprep.mubr.bf16.mxu0 %v908_v8 }
  0x4b   :  { %764 = vmatprep.mubr.bf16.mxu1 %v910_v11 }
  0x4c   :  { %1031 = vmatpush3.bf16.msra.mxu0 %v1151_v44 }
  0x4d   :  { %1053 = vmatpush3.bf16.msra.mxu1 %v1152_v45  ;;  %1032 = vmatprep.subr.bf16.mxu0 %v1153_v46 }
  0x4e   :  { %1054 = vmatprep.subr.bf16.mxu1 %v1154_v47 }
  0x50   :  { %1033 = vmatpush3.bf16.msra.mxu0 %v1155_v48  ;;  %v975_v48 = vld [vmem:[%s1335_s4] ss:$0 sm:$0xff] }
  0x51   :  { %1055 = vmatpush3.bf16.msra.mxu1 %v1156_v49  ;;  %1034 = vmatprep.subr.bf16.mxu0 %v1157_v50 }
  0x52   :  { %1056 = vmatprep.subr.bf16.mxu1 %v1158_v51 }
  0x54   :  { %1035 = vmatpush3.bf16.msra.mxu0 %v1159_v52 }
  0x55   :  { %1057 = vmatpush3.bf16.msra.mxu1 %v1160_v53  ;;  %1036 = vmatprep.subr.bf16.mxu0 %v1161_v54 }
  0x56   :  { %1058 = vmatprep.subr.bf16.mxu1 %v1162_v55 }
  0x58   :  { %1037 = vmatpush3.bf16.msra.mxu0 %v1163_v56 }
  0x59   :  { %1059 = vmatpush3.bf16.msra.mxu1 %v1164_v57  ;;  %1038 = vmatprep.subr.bf16.mxu0 %v1165_v58 }
  0x5a   :  { %1060 = vmatprep.subr.bf16.mxu1 %v1166_v59 }
  0x5c   :  { %1039 = vmatpush3.bf16.msra.mxu0 %v1167_v60 }
  0x5d   :  { %1061 = vmatpush3.bf16.msra.mxu1 %v1168_v61  ;;  %1040 = vmatprep.subr.bf16.mxu0 %v1169_v62 }
  0x5e   :  { %1062 = vmatprep.subr.bf16.mxu1 %v1170_v63 }
  0x60   :  { %1041 = vmatpush3.bf16.msra.mxu0 %v1171_v0 }
  0x61   :  { %1063 = vmatpush3.bf16.msra.mxu1 %v1172_v1  ;;  %1042 = vmatprep.subr.bf16.mxu0 %v1173_v2 }
  0x62   :  { %1064 = vmatprep.subr.bf16.mxu1 %v1174_v3 }
  0x64   :  { %1043 = vmatpush3.bf16.msra.mxu0 %v1175_v4 }
  0x65   :  { %1065 = vmatpush3.bf16.msra.mxu1 %v1176_v5  ;;  %1081 = vmatprep.subr.bf16.mxu0 %v1280_v13 }
  0x67   :  { %725 = vmatmul.mubr.bf16.vlgmr.msra.gmra.mxu0 %v907_v7 }
  0x68   :  { %765 = vmatmul.mubr.bf16.vlgmr.msra.gmra.mxu1 %v909_v10  ;;  %1082 = vmatpush3.bf16.msra.mxu0 %v1181_v12 }
  0x69   :  { %1083 = vmatprep.subr.bf16.mxu0 %v1280_v13  ;;  %1097 = vmatprep.mubr.msk.bf16.mxu0 %vm1281_vm0, %v1280_v13 }
  0x6c   :  { %1084 = vmatpush3.bf16.msra.mxu0 %v1182_v14 }
  0x6d   :  { %1085 = vmatprep.subr.bf16.mxu0 %v1280_v13 }
  0x70   :  { %1086 = vmatpush3.bf16.msra.mxu0 %v1183_v15 }
  0x71   :  { %1087 = vmatprep.subr.bf16.mxu0 %v1280_v13 }
  0x74   :  { %1088 = vmatpush3.bf16.msra.mxu0 %v1184_v16 }
  0x75   :  { %1089 = vmatprep.subr.bf16.mxu0 %v1280_v13 }
  0x78   :  { %1090 = vmatpush3.bf16.msra.mxu0 %v1185_v17 }
  0x79   :  { %1091 = vmatprep.subr.bf16.mxu0 %v1280_v13 }
  0x7c   :  { %1092 = vmatpush3.bf16.msra.mxu0 %v1186_v18 }
  0x7d   :  { %1093 = vmatprep.subr.bf16.mxu0 %v1280_v13 }
  0x80   :  { %1094 = vmatpush3.bf16.msra.mxu0 %v1187_v19 }
  0x81   :  { %1095 = vmatprep.subr.bf16.mxu0 %v1280_v13 }
  0x84   :  { %1096 = vmatpush3.bf16.msra.mxu0 %v1188_v20 }
 0x107   :  { %v1000_v21 = vpop.f32.mrf.mxu0 }
 0x108   :  { %v1022_v22 = vpop.f32.mrf.mxu1 }
 0x109   :  { %v1001_v23 = vpop.f32.mrf.mxu0 }
 0x10a   :  { %v1023_v24 = vpop.f32.mrf.mxu1  ;;  %v1002_v29 = vadd.f32 %v1001_v23, %v1000_v21 }
 0x10b   :  { %v1003_v25 = vpop.f32.mrf.mxu0  ;;  %v1024_v32 = vadd.f32 %v1023_v24, %v1022_v22 }
 0x10c   :  { %v1025_v26 = vpop.f32.mrf.mxu1  ;;  %v647_v31 = vadd.f32 %v1002_v29, %v902_v30 }
 0x10d   :  { %v1004_v27 = vpop.f32.mrf.mxu0 }
 0x10e   :  { %v1026_v28 = vpop.f32.mrf.mxu1  ;;  %v687_v37 = vadd.f32 %v1024_v32, %v647_v31 }
 0x127   :  { %v1044_v33 = vpop.f32.mrf.mxu0 }
 0x128   :  { %v1066_v34 = vpop.f32.mrf.mxu1 }
 0x129   :  { %v1045_v35 = vpop.f32.mrf.mxu0 }
 0x12a   :  { %v1067_v36 = vpop.f32.mrf.mxu1  ;;  %v1046_v38 = vadd.f32 %v1045_v35, %v1044_v33 }
 0x12b   :  { %v1047_v39 = vpop.f32.mrf.mxu0  ;;  %v1068_v42 = vadd.f32 %v1067_v36, %v1066_v34 }
 0x12c   :  { %v1069_v40 = vpop.f32.mrf.mxu1  ;;  %v727_v41 = vadd.f32 %v1046_v38, %v687_v37 }
 0x12d   :  { %v1048_v43 = vpop.f32.mrf.mxu0 }
 0x12e   :  { %v1070_v44 = vpop.f32.mrf.mxu1  ;;  %v767_v45 = vadd.f32 %v1068_v42, %v727_v41 }
 0x130   :  { %v772_v46 = vmax.f32 %v767_v45, 0.0 }
 0x132   :  { %v773_v47 = vpack.c.bf16 %v772_v46, %v772_v46 }
 0x134   :  { %1098 = vmatmul.mubr.bf16.vlgmr.msra.gmra.mxu0 %v773_v47 }
 0x1f4   :  { %v879_v49 = vpop.f32.mrf.mxu0 }
 0x1f5   :  { %v880_v50 = vadd.f32 %v975_v48, %v879_v49 }
 0x1f6   :  { %v1099_v51 = vpop.f32.mrf.mxu0 }
 0x1f7   :  { %885 = vst [vmem:[#allocation8] sm:$0xff] %v880_v50 }
 0x1f8   :  { %v882_v52 = vpop.f32.mrf.mxu0 }
 0x1f9   :  { %1260 = shalt.err (!%p1257_p5)
}
 0x1fa   :  { %895 = dma.vmem_to_hbm [thread:$0]  %s893_s11, 128, %s1336_s5, [#allocation4]   ;;  %v1100_v53 = vpop.f32.mrf.mxu0 }
 0x1fb   :  { %1273 = dma.done.wait [#allocation4], 128  }
 0x1fc   :  { %1274 = vsyncadd [#allocation4], 4294967168 }
 0x1fd   :  { %899 = vsyncpa [#allocation3], 1 }
 0x1fe   :  { %900 = vsyncpa [#allocation6], 1 }
 0x1ff   :  { %901 = vsyncpa [#allocation4], 1 }

</bundles_post_ra>
